<compile_context>
chip_gen: v6e
topology: v6e:2x2x1
jax: 0.10.0
libtpu: 0.0.40
codegen_flags: <defaults>
</compile_context>

<pallas_src>
import math
import jax
import jax.numpy as jnp
from jax.experimental import pallas as pl
from jax.experimental.pallas import tpu as pltpu


def _round_up(x, m):
    return (x + m - 1) // m * m


def _sublane_multiple(dtype):
    # Rows pack along sublanes for sub-32-bit dtypes: f32 -> 8, bf16 -> 16,
    # int8/fp8 -> 32.
    itemsize = jnp.dtype(dtype).itemsize
    return 8 * max(1, 4 // itemsize)


def affinity_kernel(x_ref, a_ref, y_ref, o_ref):
    # x_ref: (TN, d), a_ref: (d, d), y_ref: (d, TM), o_ref: (TN, TM)
    xa = jnp.dot(x_ref[...], a_ref[...],
                 preferred_element_type=jnp.float32)            # MXU
    # Cast the staging product back to the input dtype so bf16 inputs keep
    # the fast bf16 MXU path on the large (TN, TM) matmul below.
    xa = xa.astype(x_ref.dtype)
    m = jnp.dot(xa, y_ref[...],
                preferred_element_type=jnp.float32)             # MXU, NN feed
    o_ref[...] = m.astype(o_ref.dtype)


def affinity(X, Y, A, *, tn=512, tm=2048, out_dtype=None):
    """Compute M[b] = X[b] @ A @ Y[b]^T with a tiled Pallas TPU kernel."""
    B, N, d = X.shape
    Bm, M, dy = Y.shape
    assert B == Bm and d == dy and A.shape == (d, d)

    in_dtype = X.dtype
    if out_dtype is None:
        out_dtype = in_dtype
    A = A.astype(in_dtype)
    Y = Y.astype(in_dtype)
    # Lane-dense Y layout: (B, d, M) so the kernel's Y block is (d, TM).
    Yt = jnp.swapaxes(Y, 1, 2)

    sub = _sublane_multiple(in_dtype)
    assert tn % sub == 0, f"tn must be a multiple of {sub} for {in_dtype}"
    assert tm % 128 == 0, "tm must be a multiple of 128 (lane-dense output)"

    tn_eff = min(tn, _round_up(N, sub))
    tm_eff = min(tm, _round_up(M, 128))

    in_sz = jnp.dtype(in_dtype).itemsize
    out_sz = jnp.dtype(out_dtype).itemsize

    def budget(tn_, tm_):
        # Pallas double-buffers every pipelined block (X, A, Yt, out).
        return 2 * (tn_ * d * in_sz + d * d * in_sz
                    + d * tm_ * in_sz + tn_ * tm_ * out_sz)

    # Physical VMEM cap (128 MiB on v5e/v6e, 64 MiB on v7x); keep headroom
    # for Mosaic's internal scratch.
    try:
        phys = int(getattr(pltpu.get_tpu_info(), "vmem_capacity_bytes",
                           64 * 1024 * 1024))
    except Exception:
        phys = 64 * 1024 * 1024
    cap = int(phys * 0.9)

    # Shrink tiles (M-tile first) if the double-buffered working set would
    # not fit this generation's VMEM.
    while budget(tn_eff, tm_eff) > cap and tm_eff > 512:
        tm_eff = max(512, _round_up(tm_eff // 2, 128))
    while budget(tn_eff, tm_eff) > cap and tn_eff > 2 * sub:
        tn_eff = max(sub, _round_up(tn_eff // 2, sub))

    vmem_limit = int(min(cap, max(2 * budget(tn_eff, tm_eff),
                                  32 * 1024 * 1024)))

    grid = (B, pl.cdiv(N, tn_eff), pl.cdiv(M, tm_eff))

    out = pl.pallas_call(
        affinity_kernel,
        out_shape=jax.ShapeDtypeStruct((B, N, M), out_dtype),
        grid_spec=pltpu.PrefetchScalarGridSpec(
            num_scalar_prefetch=0,
            grid=grid,
            in_specs=[
                # X: (TN, d) tile for the current (batch, N-tile).
                pl.BlockSpec((pl.Squeezed(), tn_eff, d),
                             lambda b, i, j: (b, i, 0)),
                # A: whole (d, d), shared across the grid.
                pl.BlockSpec((d, d), lambda b, i, j: (0, 0)),
                # Y^T: (d, TM) tile for the current (batch, M-tile).
                pl.BlockSpec((pl.Squeezed(), d, tm_eff),
                             lambda b, i, j: (b, 0, j)),
            ],
            out_specs=pl.BlockSpec((pl.Squeezed(), tn_eff, tm_eff),
                                   lambda b, i, j: (b, i, j)),
        ),
        compiler_params=pltpu.CompilerParams(
            # No cross-step state: every grid axis is independent, so all
            # three can shard across TensorCores (relevant on v7x).
            dimension_semantics=("parallel", "parallel", "parallel"),
            vmem_limit_bytes=vmem_limit,
        ),
    )(X, A, Yt)
    return out


def init_affinity_param(key, d, dtype=jnp.float32):
    # Matches PyTorch reset_parameters: uniform(-1/sqrt(d), 1/sqrt(d)) + eye(d)
    stdv = 1.0 / math.sqrt(d)
    A = jax.random.uniform(key, (d, d), dtype=dtype, minval=-stdv, maxval=stdv)
    return A + jnp.eye(d, dtype=dtype)


if __name__ == "__main__":
    key = jax.random.PRNGKey(0)
    k_a, k_x, k_y = jax.random.split(key, 3)

    # Small test consistent with the module: B=2, N=M=8, d=32.
    B, N, M, d = 2, 8, 8, 32
    A = init_affinity_param(k_a, d)
    X = jax.random.normal(k_x, (B, N, d), dtype=jnp.float32)
    Y = jax.random.normal(k_y, (B, M, d), dtype=jnp.float32)

    out = jax.block_until_ready(affinity(X, Y, A))
    ref = jnp.einsum("bnd,de,bme->bnm", X, A, Y)
    assert out.shape == (B, N, M)
    assert jnp.allclose(out, ref, atol=1e-4, rtol=1e-4)

    # Multi-tile grid with partial edge blocks in both N and M (no padding,
    # no output slice).
    k_x2, k_y2 = jax.random.split(k_y)
    B2, N2, M2 = 2, 24, 300
    X2 = jax.random.normal(k_x2, (B2, N2, d), dtype=jnp.float32)
    Y2 = jax.random.normal(k_y2, (B2, M2, d), dtype=jnp.float32)
    out2 = jax.block_until_ready(affinity(X2, Y2, A, tn=16, tm=128))
    ref2 = jnp.einsum("bnd,de,bme->bnm", X2, A, Y2)
    assert out2.shape == (B2, N2, M2)
    assert jnp.allclose(out2, ref2, atol=1e-4, rtol=1e-4)

    # bf16 path: checks dtype-aware sublane alignment and bf16 HBM writeback.
    Xb = X2.astype(jnp.bfloat16)
    Yb = Y2.astype(jnp.bfloat16)
    Ab = A.astype(jnp.bfloat16)
    outb = jax.block_until_ready(affinity(Xb, Yb, Ab))
    refb = jnp.einsum("bnd,de,bme->bnm",
                      Xb.astype(jnp.float32), Ab.astype(jnp.float32),
                      Yb.astype(jnp.float32))
    assert outb.dtype == jnp.bfloat16 and outb.shape == (B2, N2, M2)
    assert jnp.allclose(outb.astype(jnp.float32), refb, atol=0.5, rtol=5e-2)

    print("KERNEL_OK")
</pallas_src>

<mosaic_0001>
module attributes {stable_mosaic.version = 11 : i64} {
  func.func @affinity_kernel(%arg0: i32, %arg1: i32, %arg2: i32, %arg3: memref<1x8x32xf32, #tpu.memory_space<vmem>>, %arg4: memref<32x32xf32, #tpu.memory_space<vmem>>, %arg5: memref<1x32x128xf32, #tpu.memory_space<vmem>>, %arg6: memref<1x8x128xf32, #tpu.memory_space<vmem>>) attributes {dimension_semantics = [#tpu.dimension_semantics<parallel>, #tpu.dimension_semantics<parallel>, #tpu.dimension_semantics<parallel>], iteration_bounds = array<i64: 2, 1, 1>, scalar_prefetch = 0 : i64, scratch_operands = 0 : i64, tpu.core_type = #tpu.core_type<tc>, window_params = [{transform_indices = @transform_0, window_bounds = array<i64: 1, 8, 32>}, {pipeline_mode = #tpu.pipeline_mode<synchronous>, transform_indices = @transform_1, window_bounds = array<i64: 32, 32>}, {transform_indices = @transform_2, window_bounds = array<i64: 1, 32, 128>}, {transform_indices = @transform_3, window_bounds = array<i64: 1, 8, 128>}]} {
    %c0 = arith.constant 0 : index
    %c0_0 = arith.constant 0 : index
    %c0_1 = arith.constant 0 : index
    %0 = vector.load %arg3[%c0, %c0_0, %c0_1] : memref<1x8x32xf32, #tpu.memory_space<vmem>>, vector<1x8x32xf32>
    %1 = vector.shape_cast %0 : vector<1x8x32xf32> to vector<8x32xf32>
    %c0_2 = arith.constant 0 : index
    %c0_3 = arith.constant 0 : index
    %2 = vector.load %arg4[%c0_2, %c0_3] : memref<32x32xf32, #tpu.memory_space<vmem>>, vector<32x32xf32>
    %cst = arith.constant dense<0.000000e+00> : vector<8x32xf32>
    %3 = tpu.matmul %1, %2, %cst {dimension_numbers = #tpu.dot_dimension_numbers<[1], [0], [0], [1], [0, 0, 1, 1], [], []>} : vector<8x32xf32>, vector<32x32xf32>, vector<8x32xf32> -> vector<8x32xf32>
    %c0_4 = arith.constant 0 : index
    %c0_5 = arith.constant 0 : index
    %c0_6 = arith.constant 0 : index
    %4 = vector.load %arg5[%c0_4, %c0_5, %c0_6] : memref<1x32x128xf32, #tpu.memory_space<vmem>>, vector<1x32x128xf32>
    %5 = vector.shape_cast %4 : vector<1x32x128xf32> to vector<32x128xf32>
    %cst_7 = arith.constant dense<0.000000e+00> : vector<8x128xf32>
    %6 = tpu.matmul %3, %5, %cst_7 {dimension_numbers = #tpu.dot_dimension_numbers<[1], [0], [0], [1], [0, 0, 1, 1], [], []>} : vector<8x32xf32>, vector<32x128xf32>, vector<8x128xf32> -> vector<8x128xf32>
    %c0_8 = arith.constant 0 : index
    %c0_9 = arith.constant 0 : index
    %c0_10 = arith.constant 0 : index
    %7 = vector.load %arg6[%c0_8, %c0_9, %c0_10] : memref<1x8x128xf32, #tpu.memory_space<vmem>>, vector<1x8x128xf32>
    %8 = vector.shape_cast %7 : vector<1x8x128xf32> to vector<8x128xf32>
    %9 = vector.shape_cast %6 : vector<8x128xf32> to vector<1x8x128xf32>
    tpu.vector_store %arg6[%c0_8, %c0_9, %c0_10], %9 {strides = array<i32>} : memref<1x8x128xf32, #tpu.memory_space<vmem>>, vector<1x8x128xf32>,
    return
  }
  func.func @transform_0(%arg0: i32, %arg1: i32, %arg2: i32) -> (i32, i32, i32) {
    %c0_i32 = arith.constant 0 : i32
    %c0_i32_0 = arith.constant 0 : i32
    return %arg0, %arg1, %c0_i32 : i32, i32, i32
  }
  func.func @transform_1(%arg0: i32, %arg1: i32, %arg2: i32) -> (i32, i32) {
    %c0_i32 = arith.constant 0 : i32
    %c0_i32_0 = arith.constant 0 : i32
    %c0_i32_1 = arith.constant 0 : i32
    return %c0_i32, %c0_i32_0 : i32, i32
  }
  func.func @transform_2(%arg0: i32, %arg1: i32, %arg2: i32) -> (i32, i32, i32) {
    %c0_i32 = arith.constant 0 : i32
    %c0_i32_0 = arith.constant 0 : i32
    return %arg0, %c0_i32, %arg2 : i32, i32, i32
  }
  func.func @transform_3(%arg0: i32, %arg1: i32, %arg2: i32) -> (i32, i32, i32) {
    %c0_i32 = arith.constant 0 : i32
    return %arg0, %arg1, %arg2 : i32, i32, i32
  }
}

</mosaic_0001>

<bundles_post_ra>
// kernel: tpu_custom_call.1
= control target key start
LH: loop header
LB: loop body
LE: loop exit
PB: predicated region body
PF: predicated region fallthrough
CT: control target
= control target key end

     0   :  { %8 = vsyncpa [#allocation3], 0  ;;  %s831_s0 = inlined_call_operand.vmem [shape: f32[2,8,32], index: 0, kind: input, shape index: {}]   ;;  %s832_s1 = inlined_call_operand.vmem [shape: f32[32,32], index: 1, kind: input, shape index: {}]   ;;  %s833_s2 = inlined_call_operand.vmem [shape: f32[2,32,8], index: 2, kind: input, shape index: {}]   ;;  %s834_s3 = inlined_call_operand.hbm [shape: f32[2,8,8], index: 3, kind: output, shape index: {}]  }
   0x1   :  { %10 = vsyncpa [#allocation3 + $0x1], 0  ;;  %s703_s12 = smov 0   ;;  %s705_s13 = smov 0  }
   0x2   :  { %s707_s14 = smov 0   ;;  %s709_s15 = smov 0  }
   0x3   :  { %s711_s16 = smov 0   ;;  %s713_s17 = smov 0  }
   0x4 LB: > { %s497_s18 = sadd.s32 4294967295, %s678_s17   ;;  %s498_s19 = sadd.s32 4294967294, %s678_s17   ;;  %s678_s17 = sphi %s713_s17, %s16_s17   ;;  %s674_s16 = sphi %s711_s16, %s841_s16   ;;  %s670_s15 = sphi %s709_s15, %s840_s15   ;;  %s666_s14 = sphi %s707_s14, %s839_s14   ;;  %s662_s13 = sphi %s705_s13, %s838_s13   ;;  %s658_s12 = sphi %s703_s12, %s837_s12  }
   0x5   : > { %s35_s20 = sadd.s32 1, %s674_s16  ;;  %s123_s21 = sadd.s32 1, %s666_s14 }
   0x6   : > { %p37_p0 = scmp.ge.s32.totalorder %s35_s20, 2  ;;  %p133_p1 = scmp.ne.s32.totalorder %s666_s14, %s662_s13 }
   0x7   : > { %p134_p2 = scmp.eq.s32.totalorder %s497_s18, 1  ;;  %p139_p3 = scmp.ne.s32.totalorder %s662_s13, %s658_s12 }
   0x8   : > { %s843_s20 = smov (%p37_p0, %s35_s20), 0  ;;  %p140_p5 = scmp.eq.s32.totalorder %s498_s19, 1 }
   0x9   : > { %p743_p4 = por %p134_p2, %p133_p1  ;;  %s116_s23 = ssub.s32 %s674_s16, %s843_s20 }
   0xa   : > { %p501_p6 = scmp.ge.s32.totalorder %s678_s17, 1  ;;  %p121_p7 = scmp.eq.s32.totalorder %s116_s23, 0 }
   0xb   : > { %p750_p8 = por %p140_p5, %p139_p3  ;;  %p182_p9 = scmp.lt.s32.totalorder %s678_s17, 3 }
   0xc   : > { %s756_s25 = scalar_select %p121_p7, %s666_s14, %s123_s21  }
   0xd   : > { %p183_p10 = pnand %p501_p6, %p182_p9 }
   0xe   : > { %p216_p11 = scmp.lt.s32.totalorder (!%p183_p10), %s670_s15, 1  ;;  %s213_s26 = sand.u32 (!%p183_p10), 1, %s662_s13  }
   0xf   : > { %186 = sbr.rel (%p183_p10) target bundleno = 429 (0x1ad), region = 32  ;;  %s502_s27 = sshll.u32 (!%p183_p10), %s213_s26, 3 }
  0x10   : > { %s215_s28 = scalar_lea.vmem (!%p183_p10), [#allocation2], %s502_s27 }
  0x11   : > { %s404_s29 = sshll.u32 (!%p183_p10), %s215_s28, 4  ;;  %s782_s29 = int_to_ptr.vmem [resolvable:$true] %s404_s29 }
  0x12   : > { %s602_s8 = scalar_lea.vmem (!%p183_p10), %s782_s29, 128 }
  0x13   : > { %p603_p12 = scmp.ne.s32.totalorder (!%p183_p10), %s782_s29, %s602_s8 }
  0x14   : > { %v235_v0 = vld [vmem:[%s832_s1 + $0x18] sm:$0xff]  ;;  %v680_v1 = vmov 0.0   ;;  %v234_v2 = vld [vmem:[%s832_s1 + $0x10] sm:$0xff]  ;;  %vm681_vm0 = vmmov 0   ;;  %s217_s30 = scalar_select %p216_p11, %s670_s15, 1  ;;  %v233_v3 = vld [vmem:[%s832_s1 + $0x8] sm:$0xff] }
  0x15   : > { %523 = vmatprep.subr.mxu0 %v680_v1  ;;  %531 = vmatprep.mubr.msk.f32.mxu0 %vm681_vm0, %v680_v1  ;;  %v232_v4 = vld [vmem:[%s832_s1] sm:$0xff]  ;;  %vm236_vm1 = vcmask 261120   ;;  %p604_p13 = pnand %p603_p12, %p743_p4 }
  0x16   : > { %524 = vmatpush3.msra.mxu0 %v235_v0  ;;  %534 = vmatprep.subr.mxu1 %v680_v1  ;;  %s503_s6 = sshll.u32 %s217_s30, 3  ;;  %s512_s7 = sshll.u32 %s217_s30, 5 }
  0x17   : > { %525 = vmatprep.subr.mxu0 %v680_v1  ;;  %542 = vmatprep.mubr.msk.f32.mxu1 %vm681_vm0, %v680_v1  ;;  %s222_s18 = scalar_lea.vmem %s831_s0, %s503_s6  ;;  %s230_s23 = scalar_lea.vmem %s833_s2, %s512_s7 }
  0x18   : > { %526 = vmatpush3.msra.mxu0 %v234_v2  ;;  %v231_v5 = vld [vmem:[%s222_s18] sm:$0xff]  ;;  %v313_v6 = vld [vmem:[%s230_s23 + $0x18] sm:$0xff]  ;;  %v312_v7 = vld [vmem:[%s230_s23 + $0x10] sm:$0xff]  ;;  %s509_s30 = sshll.u32 %s670_s15, 7  ;;  %s389_s7 = scalar_lea.sflag [#allocation3], %s213_s26 }
  0x19   : > { %527 = vmatprep.subr.mxu0 %v680_v1  ;;  %535 = vmatpush3.msra.mxu1 %v313_v6  ;;  %v311_v8 = vld [vmem:[%s230_s23 + $0x8] sm:$0xff]  ;;  %v310_v9 = vld [vmem:[%s230_s23] sm:$0xff]  ;;  %s787_s6 = scalar_lea.hbm %s834_s3, %s509_s30  ;;  %p605_p0 = pneg %p604_p13 }
  0x1a   : > { %528 = vmatpush3.msra.mxu0 %v233_v3  ;;  %536 = vmatprep.subr.mxu1 %v680_v1  ;;  %s682_s15 = smov [#allocation2]  }
  0x1b   : > { %529 = vmatprep.subr.mxu0 %v680_v1  ;;  %537 = vmatpush3.msra.mxu1 %v312_v7  ;;  %s606_s9 = sshll.u32 %s682_s15, 4  ;;  %s607_s9 = int_to_ptr.vmem [resolvable:$false] %s606_s9 }
  0x1c   : > { %530 = vmatpush3.msra.mxu0 %v232_v4  ;;  %538 = vmatprep.subr.mxu1 %v680_v1  ;;  %s608_s10 = scalar_lea.vmem %s607_s9, 256  ;;  %p609_p1 = scmp.lt.s32.totalorder %s782_s29, %s607_s9 }
  0x1d   : > { %532 = vmatmul.mubr.msk.f32.vlgmr.msra.gmra.mxu0 %vm236_vm1, %v231_v5  ;;  %539 = vmatpush3.msra.mxu1 %v311_v8  ;;  %p610_p2 = scmp.lt.s32.totalorder %s608_s10, %s602_s8 }
  0x1e   : > { %540 = vmatprep.subr.mxu1 %v680_v1 }
  0x1f   : > { %541 = vmatpush3.msra.mxu1 %v310_v9  ;;  %p611_p3 = por %p610_p2, %p609_p1 }
  0x21   : > { %p612_p5 = pnand %p611_p3, %p605_p0 }
  0xdd   : > { %v306_v10 = vpop.f32.mrf.mxu0 }
  0xde   : > { %543 = vmatmul.mubr.msk.f32.vlgmr.msra.gmra.mxu1 %vm236_vm1, %v306_v10 }
  0xdf   : > { %v533_v11 = vpop.f32.mrf.mxu0 }
 0x19e   : > { %v383_v12 = vpop.f32.mrf.mxu1 }
 0x19f   : > { %387 = vst [vmem:[%s215_s28] sm:$0xff] %v383_v12 }
 0x1a0   : > { %v544_v13 = vpop.f32.mrf.mxu1 }
 0x1a1   : > { %615 = shalt.err (!%p612_p5)
}
 0x1a2   : > { %s616_s11 = scalar_lea.hbm %s787_s6, 128  ;;  %s620_s21 = scalar_lea.hbm %s834_s3, 256 }
 0x1a3   : > { %p617_p6 = scmp.ne.s32.totalorder %s787_s6, %s616_s11  ;;  %p621_p10 = scmp.lt.s32.totalorder %s787_s6, %s834_s3 }
 0x1a4   : > { %p622_p11 = scmp.lt.s32.totalorder %s620_s21, %s616_s11 }
 0x1a5   : > { %p618_p7 = pnand %p617_p6, %p743_p4 }
 0x1a6   : > { %p623_p12 = por %p622_p11, %p621_p10 }
 0x1a7   : > { %p619_p9 = pneg %p618_p7 }
 0x1a9   : > { %p624_p13 = pnand %p623_p12, %p619_p9 }
 0x1ab   : > { %627 = shalt.err (!%p624_p13)
}
 0x1ac   : > { %545 = dma.vmem_to_hbm [thread:$0]  (%p743_p4), %s782_s29, 128, %s787_s6, %s389_s7  }
 0x1ad PF: > { %p551_p0 = scmp.ge.s32.totalorder %s678_s17, 2  ;;  %s416_s27 = sand.u32 1, %s658_s12  }
 0x1ae   : > { %s417_s28 = scalar_lea.sflag [#allocation3], %s416_s27 }
 0x1af   : > { %p548_p1 = pnand %p551_p0, %p750_p8 }
 0x1b1   : > { %p549_p2 = pneg %p548_p1 }
 0x1b3   : > { %653 = dma.done.wait (%p549_p2), %s417_s28, 128  }
 0x1b4   : > { %655 = vsyncadd (%p549_p2), %s417_s28, 4294967168  ;;  %s16_s17 = sadd.s32 1, %s678_s17   ;;  %s837_s12 = smov %s662_s13 }
 0x1b5   : > { %p13_p3 = scmp.ge.s32.totalorder %s16_s17, 4   ;;  %s838_s13 = smov %s666_s14 }
 0x1b6   : > { %s839_s14 = smov %s756_s25  ;;  %s840_s15 = smov %s674_s16 }
 0x1b7   : > { %s841_s16 = smov %s843_s20  ;;  %15 = sbr.rel (!%p13_p3) target bundleno = 4 (0x4), region = 70 }
 0x1bc   :  { %422 = vsyncpa [#allocation3], 1 }
 0x1bd   :  { %424 = vsyncpa [#allocation3 + $0x1], 1 }

</bundles_post_ra>
